<compile_context>
chip_gen: v6e
topology: v6e:2x2x1
jax: 0.10.0
libtpu: 0.0.40
codegen_flags: <defaults>
</compile_context>

<pallas_src>
import jax
import jax.numpy as jnp
from jax.experimental import pallas as pl
from jax.experimental.pallas import tpu as pltpu

_LANES = 128


def _skl_kernel(p_ref, q_ref, out_ref):
    # Compute in f32 regardless of storage dtype (free: kernel is HBM-bound).
    p = p_ref[...].astype(jnp.float32)
    q = q_ref[...].astype(jnp.float32)
    # Two-log form (matches torch exactly in spirit; no under/overflow of q/p).
    half_d = 0.5 * (jnp.log(q) - jnp.log(p))
    # xlogy-style zero handling: matches torch.nn.functional.kl_div (target == 0 -> 0).
    t1 = jnp.where(q > 0, q * half_d, 0.0)   # = 0.5 * kl_div(out1.log(), out2)
    t2 = jnp.where(p > 0, p * half_d, 0.0)   # = -0.5 * kl_div(out2.log(), out1)
    out_ref[...] = (t1 - t2).astype(out_ref.dtype)


def _skl_xla(p, q):
    # Fused XLA fallback for tiny or awkwardly-sized inputs (cheaper than pallas_call
    # dispatch / a wrapper padding copy).  Same formula as the kernel.
    dtype = p.dtype
    pf = p.astype(jnp.float32)
    qf = q.astype(jnp.float32)
    half_d = 0.5 * (jnp.log(qf) - jnp.log(pf))
    t1 = jnp.where(qf > 0, qf * half_d, 0.0)
    t2 = jnp.where(pf > 0, pf * half_d, 0.0)
    return (t1 - t2).astype(dtype)


def _round_up(x, m):
    return ((x + m - 1) // m) * m


def _physical_vmem_bytes():
    """Best-effort VMEM capacity query; conservative 64 MiB (v7x) fallback."""
    try:
        return int(pltpu.get_tpu_info().vmem_capacity_bytes)
    except Exception:
        pass
    try:
        kind = jax.devices()[0].device_kind.lower()
        if "v7" in kind:
            return 64 << 20
        if "v4" in kind or "v5" in kind or "v6" in kind:
            return 128 << 20
    except Exception:
        pass
    return 64 << 20


def _choose_tile_rows(rows, max_tile_rows, sublane, min_steps=8):
    if rows <= sublane:
        return rows                                   # full-dim block is always legal
    t = min(max_tile_rows, rows)
    if rows >= min_steps * sublane:
        # Keep >= min_steps grid steps: with 8 steps each v7x TensorCore gets >= 4,
        # so the pipeline overlaps writeback(i-1) / compute(i) / fetch(i+1).
        t = min(t, _round_up(pl.cdiv(rows, min_steps), sublane))
    return max(sublane, (t // sublane) * sublane)      # sublane-aligned block


def skl_div_loss(out1, out2, *, max_block_bytes=None, min_pallas_elems=(1 << 18)):
    assert out1.shape == out2.shape and out1.dtype == out2.dtype
    orig_shape = out1.shape
    dtype = out1.dtype
    n = out1.size

    # Small-input fast path, and the (rare) flat size not divisible by 128 lanes:
    # a fused XLA expression wins there and avoids duplicating HBM traffic with padding.
    if n < min_pallas_elems or n % _LANES != 0:
        return _skl_xla(out1, out2)

    rows = n // _LANES
    p2d = out1.reshape(rows, _LANES)   # no-copy reshape to a lane-dense slab
    q2d = out2.reshape(rows, _LANES)

    itemsize = jnp.dtype(dtype).itemsize
    sublane = {4: 8, 2: 16, 1: 32}.get(itemsize, 8)

    if max_block_bytes is None:
        # 4 MiB blocks fit v7x's 64 MiB VMEM comfortably (3 arrays x 2 bufs = 24 MiB);
        # 8 MiB blocks are fine on v5e/v6e's 128 MiB and shave the per-step overhead
        # below 5% on the largest inputs.
        max_block_bytes = (8 << 20) if _physical_vmem_bytes() >= (96 << 20) else (4 << 20)
    max_tile_rows = max(sublane, max_block_bytes // (_LANES * itemsize))

    tile_rows = _choose_tile_rows(rows, max_tile_rows, sublane)
    grid = (pl.cdiv(rows, tile_rows),)  # ragged last block is masked by Pallas

    block_bytes = tile_rows * _LANES * itemsize
    # 2 inputs + 1 output, double-buffered, plus headroom; never below the smallest
    # default scoped limit (v5e's default is only 16 MiB, so the explicit limit is
    # mandatory there even at modest tiles).
    vmem_limit = max(3 * 2 * block_bytes + (4 << 20), 16 << 20)

    out2d = pl.pallas_call(
        _skl_kernel,
        out_shape=jax.ShapeDtypeStruct((rows, _LANES), dtype),
        grid_spec=pltpu.PrefetchScalarGridSpec(
            num_scalar_prefetch=0,
            grid=grid,
            in_specs=[
                pl.BlockSpec((tile_rows, _LANES), lambda i: (i, 0)),
                pl.BlockSpec((tile_rows, _LANES), lambda i: (i, 0)),
            ],
            out_specs=pl.BlockSpec((tile_rows, _LANES), lambda i: (i, 0)),
        ),
        compiler_params=pltpu.CompilerParams(
            dimension_semantics=("parallel",),
            vmem_limit_bytes=vmem_limit,
        ),
    )(p2d, q2d)

    return out2d.reshape(orig_shape)


if __name__ == "__main__":
    key = jax.random.PRNGKey(0)
    k1, k2 = jax.random.split(key)

    B, C, H, W = 2, 4, 16, 16
    # Probability-like inputs (softmax over the channel axis), matching typical BAIT usage.
    logits1 = jax.random.normal(k1, (B, C, H, W), dtype=jnp.float32)
    logits2 = jax.random.normal(k2, (B, C, H, W), dtype=jnp.float32)
    out1 = jax.nn.softmax(logits1, axis=1)
    out2 = jax.nn.softmax(logits2, axis=1)

    # Force the Pallas path even at this small demo size so the kernel is exercised
    # (production sizes go through it automatically; tiny ones take the XLA fast path).
    result = skl_div_loss(out1, out2, min_pallas_elems=0)
    jax.block_until_ready(result)

    # Plain-JAX reference (two-log form, identical semantics).
    ref = 0.5 * (out2 * (jnp.log(out2) - jnp.log(out1))
                 + out1 * (jnp.log(out1) - jnp.log(out2)))
    assert result.shape == (B, C, H, W)
    assert jnp.allclose(result, ref, atol=1e-5, rtol=1e-5)

    print("KERNEL_OK")
</pallas_src>

<mosaic_0001>
module attributes {stable_mosaic.version = 11 : i64} {
  func.func @_skl_kernel(%arg0: i32, %arg1: memref<16x128xf32, #tpu.memory_space<vmem>>, %arg2: memref<16x128xf32, #tpu.memory_space<vmem>>, %arg3: memref<16x128xf32, #tpu.memory_space<vmem>>) attributes {dimension_semantics = [#tpu.dimension_semantics<parallel>], iteration_bounds = array<i64: 1>, scalar_prefetch = 0 : i64, scratch_operands = 0 : i64, tpu.core_type = #tpu.core_type<tc>, window_params = [{transform_indices = @transform_0, window_bounds = array<i64: 16, 128>}, {transform_indices = @transform_1, window_bounds = array<i64: 16, 128>}, {transform_indices = @transform_2, window_bounds = array<i64: 16, 128>}]} {
    %c0 = arith.constant 0 : index
    %c0_0 = arith.constant 0 : index
    %0 = vector.load %arg1[%c0, %c0_0] : memref<16x128xf32, #tpu.memory_space<vmem>>, vector<16x128xf32>
    %c0_1 = arith.constant 0 : index
    %c0_2 = arith.constant 0 : index
    %1 = vector.load %arg2[%c0_1, %c0_2] : memref<16x128xf32, #tpu.memory_space<vmem>>, vector<16x128xf32>
    %2 = math.log %1 : vector<16x128xf32>
    %3 = math.log %0 : vector<16x128xf32>
    %4 = arith.subf %2, %3 : vector<16x128xf32>
    %cst = arith.constant 5.000000e-01 : f32
    %5 = vector.broadcast %cst : f32 to vector<16x128xf32>
    %6 = arith.mulf %5, %4 : vector<16x128xf32>
    %cst_3 = arith.constant 0.000000e+00 : f32
    %7 = vector.broadcast %cst_3 : f32 to vector<16x128xf32>
    %8 = arith.cmpf ogt, %1, %7 : vector<16x128xf32>
    %9 = arith.mulf %1, %6 : vector<16x128xf32>
    %cst_4 = arith.constant 0.000000e+00 : f32
    %10 = vector.broadcast %cst_4 : f32 to vector<16x128xf32>
    %11 = arith.select %8, %9, %10 : vector<16x128xi1>, vector<16x128xf32>
    %cst_5 = arith.constant 0.000000e+00 : f32
    %12 = vector.broadcast %cst_5 : f32 to vector<16x128xf32>
    %13 = arith.cmpf ogt, %0, %12 : vector<16x128xf32>
    %14 = arith.mulf %0, %6 : vector<16x128xf32>
    %cst_6 = arith.constant 0.000000e+00 : f32
    %15 = vector.broadcast %cst_6 : f32 to vector<16x128xf32>
    %16 = arith.select %13, %14, %15 : vector<16x128xi1>, vector<16x128xf32>
    %17 = arith.subf %11, %16 : vector<16x128xf32>
    %c0_7 = arith.constant 0 : index
    %c0_8 = arith.constant 0 : index
    %18 = vector.load %arg3[%c0_7, %c0_8] : memref<16x128xf32, #tpu.memory_space<vmem>>, vector<16x128xf32>
    tpu.vector_store %arg3[%c0_7, %c0_8], %17 {strides = array<i32>} : memref<16x128xf32, #tpu.memory_space<vmem>>, vector<16x128xf32>,
    return
  }
  func.func @transform_0(%arg0: i32) -> (i32, i32) {
    %c0_i32 = arith.constant 0 : i32
    %c0_i32_0 = arith.constant 0 : i32
    return %arg0, %c0_i32 : i32, i32
  }
  func.func @transform_1(%arg0: i32) -> (i32, i32) {
    %c0_i32 = arith.constant 0 : i32
    %c0_i32_0 = arith.constant 0 : i32
    return %arg0, %c0_i32 : i32, i32
  }
  func.func @transform_2(%arg0: i32) -> (i32, i32) {
    %c0_i32 = arith.constant 0 : i32
    %c0_i32_0 = arith.constant 0 : i32
    return %arg0, %c0_i32 : i32, i32
  }
}

</mosaic_0001>

<bundles_post_ra>
// kernel: tpu_custom_call.1
= control target key start
LH: loop header
LB: loop body
LE: loop exit
PB: predicated region body
PF: predicated region fallthrough
CT: control target
= control target key end

     0   :  { %7 = vsyncpa [#allocation3], 0  ;;  %s207_s0 = inlined_call_operand.hbm [shape: f32[16,128], index: 0, kind: input, shape index: {}]   ;;  %s208_s1 = inlined_call_operand.hbm [shape: f32[16,128], index: 1, kind: input, shape index: {}]   ;;  %s209_s2 = inlined_call_operand.hbm [shape: f32[16,128], index: 2, kind: output, shape index: {}]  }
   0x1   :  { %8 = vsyncpa [#allocation6], 0 }
   0x2   :  { %9 = vsyncpa [#allocation4], 0  ;;  %s169_s9 = smov [#allocation2]  }
   0x3   :  { %s15_s10 = sshll.u32 %s169_s9, 4  ;;  %s16_s10 = int_to_ptr.vmem [resolvable:$true] %s15_s10 }
   0x4   :  { %s111_s11 = scalar_lea.vmem %s16_s10, 256  ;;  %p116_p1 = scmp.lt.s32.totalorder %s16_s10, %s16_s10 }
   0x5   :  { %p112_p0 = scmp.ne.s32.totalorder %s16_s10, %s111_s11  ;;  %p117_p2 = scmp.lt.s32.totalorder %s111_s11, %s111_s11 }
   0x7   :  { %p118_p3 = por %p117_p2, %p116_p1 }
   0x9   :  { %p119_p4 = pnand %p118_p3, %p112_p0 }
   0xb   :  { %122 = shalt.err (!%p119_p4)
}
   0xc   :  { %s170_s12 = smov 128   ;;  %s171_s13 = smov 8  }
   0xd   :  { %21 = dma.hbm_to_vmem [thread:$0]  %s207_s0, 256, %s16_s10, [#allocation3], %s170_s12, %s170_s12, %s171_s13  }
   0xe   :  { %s172_s16 = smov [#allocation5]  }
   0xf   :  { %s27_s17 = sshll.u32 %s172_s16, 4  ;;  %s28_s17 = int_to_ptr.vmem [resolvable:$true] %s27_s17 }
  0x10   :  { %s131_s18 = scalar_lea.vmem %s28_s17, 256  ;;  %p136_p6 = scmp.lt.s32.totalorder %s28_s17, %s28_s17 }
  0x11   :  { %p132_p5 = scmp.ne.s32.totalorder %s28_s17, %s131_s18  ;;  %p137_p7 = scmp.lt.s32.totalorder %s131_s18, %s131_s18 }
  0x13   :  { %p138_p8 = por %p137_p7, %p136_p6 }
  0x15   :  { %p139_p9 = pnand %p138_p8, %p132_p5 }
  0x17   :  { %142 = shalt.err (!%p139_p9)
}
  0x18   :  { %33 = dma.hbm_to_vmem [thread:$0]  %s208_s1, 256, %s28_s17, [#allocation6], %s170_s12, %s170_s12, %s171_s13  }
  0x19   :  { %163 = dma.done.wait [#allocation3], 256  }
  0x1a   :  { %164 = vsyncadd [#allocation3], 4294967040 }
  0x1b   :  { %165 = dma.done.wait [#allocation6], 256  }
  0x1c   :  { %166 = vsyncadd [#allocation6], 4294967040  ;;  %v40_v0 = vld [vmem:[#allocation2] sm:$0xff]  ;;  %v42_v1 = vld [vmem:[#allocation5] sm:$0xff]  ;;  %s173_s0 = smov [#allocation7]  }
  0x1d   :  { %95 = vlog2.f32 %v42_v1  ;;  %v41_v2 = vld [vmem:[#allocation2 + $0x8] sm:$0xff]  ;;  %v43_v3 = vld [vmem:[#allocation5 + $0x8] sm:$0xff]  ;;  %vm56_vm0 = vcmp.gt.f32.partialorder %v42_v1, 0.0  ;;  %vm62_vm1 = vcmp.gt.f32.partialorder %v40_v0, 0.0  ;;  %s77_s1 = sshll.u32 %s173_s0, 4  ;;  %s78_s1 = int_to_ptr.vmem [resolvable:$true] %s77_s1 }
  0x1e   :  { %97 = vlog2.f32 %v40_v0  ;;  %vm57_vm2 = vcmp.gt.f32.partialorder %v43_v3, 0.0  ;;  %vm63_vm3 = vcmp.gt.f32.partialorder %v41_v2, 0.0  ;;  %s143_s21 = scalar_lea.vmem %s78_s1, 256  ;;  %p148_p11 = scmp.lt.s32.totalorder %s78_s1, %s78_s1 }
  0x1f   :  { %99 = vlog2.f32 %v43_v3  ;;  %p144_p10 = scmp.ne.s32.totalorder %s78_s1, %s143_s21  ;;  %p149_p12 = scmp.lt.s32.totalorder %s143_s21, %s143_s21 }
  0x20   :  { %101 = vlog2.f32 %v41_v2 }
  0x21   :  { %p150_p13 = por %p149_p12, %p148_p11 }
  0x23   :  { %p151_p0 = pnand %p150_p13, %p144_p10 }
  0x2a   :  { %v96_v4 = vpop.eup %95 }
  0x2b   :  { %v98_v5 = vpop.eup %97  ;;  %v45_v6 = vmul.f32 0.6931472, %v96_v4 }
  0x2c   :  { %v100_v7 = vpop.eup %99  ;;  %v49_v8 = vmul.f32 0.6931472, %v98_v5 }
  0x2d   :  { %v102_v9 = vpop.eup %101  ;;  %v47_v10 = vmul.f32 0.6931472, %v100_v7 }
  0x2e   :  { %v52_v11 = vsub.f32 %v45_v6, %v49_v8  ;;  %v51_v12 = vmul.f32 0.6931472, %v102_v9 }
  0x30   :  { %v54_v13 = vmul.f32 0.5, %v52_v11  ;;  %v53_v14 = vsub.f32 %v47_v10, %v51_v12 }
  0x32   :  { %v58_v15 = vmul.f32 %v54_v13, %v42_v1  ;;  %v64_v16 = vmul.f32 %v54_v13, %v40_v0  ;;  %v55_v17 = vmul.f32 0.5, %v53_v14 }
  0x34   :  { %v60_v18 = vsel %vm56_vm0, %v58_v15, 0.0  ;;  %v66_v19 = vsel %vm62_vm1, %v64_v16, 0.0  ;;  %v59_v20 = vmul.f32 %v55_v17, %v43_v3  ;;  %v65_v21 = vmul.f32 %v55_v17, %v41_v2 }
  0x35   :  { %v68_v22 = vsub.f32 %v60_v18, %v66_v19 }
  0x36   :  { %v61_v23 = vsel %vm57_vm2, %v59_v20, 0.0  ;;  %v67_v24 = vsel %vm63_vm3, %v65_v21, 0.0 }
  0x37   :  { %70 = vst [vmem:[#allocation7] sm:$0xff] %v68_v22  ;;  %v69_v25 = vsub.f32 %v61_v23, %v67_v24 }
  0x39   :  { %71 = vst [vmem:[#allocation7 + $0x8] sm:$0xff] %v69_v25 }
  0x3a   :  { %154 = shalt.err (!%p151_p0)
}
  0x3b   :  { %83 = dma.vmem_to_hbm [thread:$0]  %s78_s1, 256, %s209_s2, [#allocation4], %s170_s12, %s170_s12, %s171_s13  }
  0x3c   :  { %167 = dma.done.wait [#allocation4], 256  }
  0x3d   :  { %168 = vsyncadd [#allocation4], 4294967040 }
  0x3e   :  { %87 = vsyncpa [#allocation3], 1 }
  0x3f   :  { %88 = vsyncpa [#allocation6], 1 }
  0x40   :  { %89 = vsyncpa [#allocation4], 1 }

</bundles_post_ra>
